<compile_context>
chip_gen: v6e
topology: v6e:2x2x1
jax: 0.10.0
libtpu: 0.0.40
codegen_flags: <defaults>
</compile_context>

<pallas_src>
import functools

import jax
import jax.numpy as jnp
from jax.experimental import pallas as pl
from jax.experimental.pallas import tpu as pltpu

# ----- small, module-consistent static sizes -----
B = 2            # batch
L = 13           # number of BERT hidden-state layers == conv in/out channels
S = 10           # sequence length (original model uses S=36 -> 13*(36-2)=442 fc inputs)
H = 128          # hidden size (original model uses 1024)
KH = 3           # conv kernel height
POOL = 3         # maxpool window along seq
S_OUT = S - (POOL - 1)
NUM_CLASSES = 3
LH = L * H
N_PAD = 128                       # packed conv-out columns (3*13=39) padded to 1 lane group
S_PAD = -(-(S + 2) // 8) * 8      # per-batch rows incl. conv zero-pad rows, rounded to 8 -> 16


def bert_cnn_kernel(x_ref, wconv_ref, bconv_ref, wfc_ref, bfc_ref, o_ref):
    # x_ref:     (nb*S_PAD, L*H) bf16  -- per-batch blocks of S_PAD rows:
    #            row 0 = 0 (seq pad s=-1), rows 1..S = sequence, rows S+1.. = 0.
    # wconv_ref: (L*H, N_PAD)     bf16 -- conv weight, kh taps at lane offsets 0/13/26.
    # bconv_ref: (1, L)           f32
    # wfc_ref:   (NUM_CLASSES, S_OUT, L) f32 -- fc weight repacked to [cls, s, co]
    # bfc_ref:   (NUM_CLASSES, 1) f32
    # o_ref:     (nb, NUM_CLASSES, 1) f32
    rows = x_ref.shape[0]
    nb = rows // S_PAD

    # Whole Conv2d(13,13,(3,H),padding=(1,0)) as ONE bf16 MXU matmul (f32 accumulation).
    y = jnp.dot(x_ref[...], wconv_ref[...], preferred_element_type=jnp.float32)

    # Combine the three kh taps: out[s] = y_kh0[s-1] + y_kh1[s] + y_kh2[s+1].  The zero
    # rows pre-inserted in x supply the sequence zero-padding, so plain offset slices do
    # the shift (no concat, no boundary masks) and nothing bleeds across batch blocks.
    acc = (y[0:rows - 2, 0 * L:1 * L]
           + y[1:rows - 1, 1 * L:2 * L]
           + y[2:rows, 2 * L:3 * L])                         # (rows-2, 13)
    acc = jnp.maximum(acc + bconv_ref[...], 0.0)             # conv bias + ReLU

    # MaxPool2d(kernel=(3, 1), stride=(1, 1)) along the sequence axis.
    pooled = jnp.maximum(jnp.maximum(acc[0:rows - 4], acc[1:rows - 3]),
                         acc[2:rows - 2])                    # (rows-4, 13)

    wfc = wfc_ref[...]        # hoisted out of the per-batch loop (no re-load per iter)
    bfc = bfc_ref[...]
    for b in range(nb):
        pb = pooled[b * S_PAD:b * S_PAD + S_OUT]             # (S_OUT, 13), aligned slice
        # Flatten + Linear(L*S_OUT, 3): fused multiply + lane/sublane reductions.
        prod = pb[None, :, :] * wfc                          # (3, S_OUT, 13)
        cls = jnp.sum(jnp.sum(prod, axis=2), axis=1, keepdims=True)   # (3, 1)
        logits = cls + bfc                                   # (3, 1)
        # LogSoftmax(dim=1) over the 3 classes.
        m = jnp.maximum(jnp.maximum(logits[0:1], logits[1:2]), logits[2:3])
        z = logits - m
        e = jnp.exp(z)
        lse = jnp.log(e[0:1] + e[1:2] + e[2:3])
        o_ref[b] = (z - lse).astype(o_ref.dtype)


def prepare_params(w_conv, b_conv, w_fc, b_fc):
    """One-time weight repack (hoisted out of the per-call path, per review)."""
    # torch conv weight (co, ci, kh, w=H) -> [ci*H + w, kh*13 + co], lanes padded 39 -> 128.
    wc = jnp.transpose(w_conv, (1, 3, 2, 0)).reshape(LH, KH * L)
    wc = jnp.pad(wc, ((0, 0), (0, N_PAD - KH * L))).astype(jnp.bfloat16)
    bc = b_conv.astype(jnp.float32).reshape(1, L)
    # torch fc weight (3, L*S_OUT) with flatten index co*S_OUT + s  ->  [cls, s, co].
    wf = w_fc.astype(jnp.float32).reshape(NUM_CLASSES, L, S_OUT).transpose(0, 2, 1)
    bf = b_fc.astype(jnp.float32).reshape(NUM_CLASSES, 1)
    return wc, bc, wf, bf


@functools.partial(jax.jit, static_argnames=("batch_parallel",))
def bert_cnn_forward(hidden_states, wc, bc, wf, bf, *, batch_parallel=False):
    """hidden_states: (B, L, S, H) == torch.stack(all_layers, 0).permute(1, 0, 2, 3)."""
    # Per-call activation prep (tiny, ~100 KB; fuses under jit): (B,L,S,H) -> (B,S,L*H),
    # insert the conv's zero seq-pad rows, round the per-batch row count up to a sublane
    # multiple, flatten batches, and cast to bf16 for the MXU.
    x = jnp.transpose(hidden_states, (0, 2, 1, 3)).reshape(B, S, LH)
    x = jnp.pad(x, ((0, 0), (1, S_PAD - S - 1), (0, 0)))
    x = x.reshape(B * S_PAD, LH).astype(jnp.bfloat16)

    if batch_parallel:
        # v7x: one batch row per grid step -> the two rows land on the two TensorCores.
        grid = (B,)
        x_spec = pl.BlockSpec((S_PAD, LH), lambda b: (b, 0))
        o_spec = pl.BlockSpec((1, NUM_CLASSES, 1), lambda b: (b, 0, 0))
        semantics = ("parallel",)
    else:
        # v5e / v6e (single TC): whole batch in one step, no per-step pipeline overhead.
        grid = (1,)
        x_spec = pl.BlockSpec((B * S_PAD, LH), lambda i: (0, 0))
        o_spec = pl.BlockSpec((B, NUM_CLASSES, 1), lambda i: (0, 0, 0))
        semantics = ("arbitrary",)

    grid_spec = pltpu.PrefetchScalarGridSpec(
        num_scalar_prefetch=0,
        grid=grid,
        in_specs=[
            x_spec,
            pl.BlockSpec((LH, N_PAD), lambda i: (0, 0)),
            pl.BlockSpec((1, L), lambda i: (0, 0)),
            pl.BlockSpec((NUM_CLASSES, S_OUT, L), lambda i: (0, 0, 0)),
            pl.BlockSpec((NUM_CLASSES, 1), lambda i: (0, 0)),
        ],
        out_specs=o_spec,
    )
    out = pl.pallas_call(
        bert_cnn_kernel,
        out_shape=jax.ShapeDtypeStruct((B, NUM_CLASSES, 1), jnp.float32),
        grid_spec=grid_spec,
        compiler_params=pltpu.CompilerParams(dimension_semantics=semantics),
    )(x, wc, bc, wf, bf)
    return out.reshape(B, NUM_CLASSES)


def reference_forward(hidden_states, w_conv, b_conv, w_fc, b_fc):
    """Pure-JAX replica of the PyTorch graph (eval mode) for verification (f32)."""
    conv = jax.lax.conv_general_dilated(
        hidden_states, w_conv, window_strides=(1, 1),
        padding=((1, 1), (0, 0)),
        dimension_numbers=('NCHW', 'OIHW', 'NCHW'))            # (B, 13, S, 1)
    conv = conv + b_conv[None, :, None, None]
    r = jnp.maximum(conv, 0.0)
    p = jax.lax.reduce_window(r, -jnp.inf, jax.lax.max,
                              window_dimensions=(1, 1, POOL, 1),
                              window_strides=(1, 1, 1, 1),
                              padding='VALID')                  # (B, 13, S-2, 1)
    flat = p.reshape(B, -1)                                     # torch Flatten order
    logits = flat @ w_fc.T + b_fc
    return jax.nn.log_softmax(logits, axis=1)


if __name__ == "__main__":
    key = jax.random.PRNGKey(0)
    k1, k2, k3, k4, k5 = jax.random.split(key, 5)

    # synthetic "BERT hidden states" stack, already permuted to (B, 13, S, H)
    hidden_states = jax.random.normal(k1, (B, L, S, H), jnp.float32)

    # deterministic synthetic parameters (shapes from the module's __init__)
    w_conv = jax.random.normal(k2, (L, L, KH, H), jnp.float32) * 0.02
    b_conv = jax.random.normal(k3, (L,), jnp.float32) * 0.02
    w_fc = jax.random.normal(k4, (NUM_CLASSES, L * S_OUT), jnp.float32) * 0.05
    b_fc = jax.random.normal(k5, (NUM_CLASSES,), jnp.float32) * 0.05

    # one-time weight repack (kept out of the per-call path)
    params = jax.block_until_ready(prepare_params(w_conv, b_conv, w_fc, b_fc))

    out = jax.block_until_ready(bert_cnn_forward(hidden_states, *params))
    out_par = jax.block_until_ready(
        bert_cnn_forward(hidden_states, *params, batch_parallel=True))
    ref = jax.block_until_ready(
        reference_forward(hidden_states, w_conv, b_conv, w_fc, b_fc))

    assert out.shape == (B, NUM_CLASSES)
    assert out_par.shape == (B, NUM_CLASSES)
    # bf16 matmul inputs (f32 accumulation) vs the f32 reference -> looser tolerance.
    assert jnp.allclose(out, ref, atol=2e-2, rtol=2e-2), (out, ref)
    assert jnp.allclose(out_par, ref, atol=2e-2, rtol=2e-2), (out_par, ref)
    print("KERNEL_OK")
</pallas_src>

<mosaic_0001>
module attributes {stable_mosaic.version = 11 : i64} {
  func.func @bert_cnn_kernel(%arg0: i32, %arg1: memref<32x1664xbf16, #tpu.memory_space<vmem>>, %arg2: memref<1664x128xbf16, #tpu.memory_space<vmem>>, %arg3: memref<1x13xf32, #tpu.memory_space<vmem>>, %arg4: memref<3x8x13xf32, #tpu.memory_space<vmem>>, %arg5: memref<3x1xf32, #tpu.memory_space<vmem>>, %arg6: memref<2x3x1xf32, #tpu.memory_space<vmem>>) attributes {dimension_semantics = [#tpu.dimension_semantics<arbitrary>], iteration_bounds = array<i64: 1>, scalar_prefetch = 0 : i64, scratch_operands = 0 : i64, tpu.core_type = #tpu.core_type<tc>, window_params = [{pipeline_mode = #tpu.pipeline_mode<synchronous>, transform_indices = @transform_0, window_bounds = array<i64: 32, 1664>}, {pipeline_mode = #tpu.pipeline_mode<synchronous>, transform_indices = @transform_1, window_bounds = array<i64: 1664, 128>}, {pipeline_mode = #tpu.pipeline_mode<synchronous>, transform_indices = @transform_2, window_bounds = array<i64: 1, 13>}, {pipeline_mode = #tpu.pipeline_mode<synchronous>, transform_indices = @transform_3, window_bounds = array<i64: 3, 8, 13>}, {pipeline_mode = #tpu.pipeline_mode<synchronous>, transform_indices = @transform_4, window_bounds = array<i64: 3, 1>}, {pipeline_mode = #tpu.pipeline_mode<synchronous>, transform_indices = @transform_5, window_bounds = array<i64: 2, 3, 1>}]} {
    %c0 = arith.constant 0 : index
    %c0_0 = arith.constant 0 : index
    %0 = vector.load %arg1[%c0, %c0_0] : memref<32x1664xbf16, #tpu.memory_space<vmem>>, vector<32x1664xbf16>
    %c0_1 = arith.constant 0 : index
    %c0_2 = arith.constant 0 : index
    %1 = vector.load %arg2[%c0_1, %c0_2] : memref<1664x128xbf16, #tpu.memory_space<vmem>>, vector<1664x128xbf16>
    %cst = arith.constant dense<0.000000e+00> : vector<32x128xf32>
    %2 = tpu.matmul %0, %1, %cst {dimension_numbers = #tpu.dot_dimension_numbers<[1], [0], [0], [1], [0, 0, 1, 1], [], []>} : vector<32x1664xbf16>, vector<1664x128xbf16>, vector<32x128xf32> -> vector<32x128xf32>
    %3 = vector.extract_strided_slice %2 {offsets = [0, 0], sizes = [30, 13], strides = [1, 1]} : vector<32x128xf32> to vector<30x13xf32>
    %4 = vector.extract_strided_slice %2 {offsets = [1, 13], sizes = [30, 13], strides = [1, 1]} : vector<32x128xf32> to vector<30x13xf32>
    %5 = arith.addf %3, %4 : vector<30x13xf32>
    %6 = vector.extract_strided_slice %2 {offsets = [2, 26], sizes = [30, 13], strides = [1, 1]} : vector<32x128xf32> to vector<30x13xf32>
    %7 = arith.addf %5, %6 : vector<30x13xf32>
    %c0_3 = arith.constant 0 : index
    %c0_4 = arith.constant 0 : index
    %8 = vector.load %arg3[%c0_3, %c0_4] : memref<1x13xf32, #tpu.memory_space<vmem>>, vector<1x13xf32>
    %9 = vector.broadcast %8 : vector<1x13xf32> to vector<30x13xf32>
    %10 = arith.addf %7, %9 : vector<30x13xf32>
    %cst_5 = arith.constant 0.000000e+00 : f32
    %11 = vector.broadcast %cst_5 : f32 to vector<30x13xf32>
    %12 = arith.maximumf %10, %11 : vector<30x13xf32>
    %13 = vector.extract_strided_slice %12 {offsets = [0, 0], sizes = [28, 13], strides = [1, 1]} : vector<30x13xf32> to vector<28x13xf32>
    %14 = vector.extract_strided_slice %12 {offsets = [1, 0], sizes = [28, 13], strides = [1, 1]} : vector<30x13xf32> to vector<28x13xf32>
    %15 = arith.maximumf %13, %14 : vector<28x13xf32>
    %16 = vector.extract_strided_slice %12 {offsets = [2, 0], sizes = [28, 13], strides = [1, 1]} : vector<30x13xf32> to vector<28x13xf32>
    %17 = arith.maximumf %15, %16 : vector<28x13xf32>
    %c0_6 = arith.constant 0 : index
    %c0_7 = arith.constant 0 : index
    %c0_8 = arith.constant 0 : index
    %18 = vector.load %arg4[%c0_6, %c0_7, %c0_8] : memref<3x8x13xf32, #tpu.memory_space<vmem>>, vector<3x8x13xf32>
    %c0_9 = arith.constant 0 : index
    %c0_10 = arith.constant 0 : index
    %19 = vector.load %arg5[%c0_9, %c0_10] : memref<3x1xf32, #tpu.memory_space<vmem>>, vector<3x1xf32>
    %20 = vector.extract_strided_slice %17 {offsets = [0, 0], sizes = [8, 13], strides = [1, 1]} : vector<28x13xf32> to vector<8x13xf32>
    %21 = vector.shape_cast %20 : vector<8x13xf32> to vector<1x8x13xf32>
    %22 = vector.broadcast %21 : vector<1x8x13xf32> to vector<3x8x13xf32>
    %23 = arith.mulf %22, %18 : vector<3x8x13xf32>
    %cst_11 = arith.constant dense<0.000000e+00> : vector<3x8xf32>
    %24 = vector.multi_reduction <add>, %23, %cst_11 [2] : vector<3x8x13xf32> to vector<3x8xf32>
    %cst_12 = arith.constant dense<0.000000e+00> : vector<3xf32>
    %25 = vector.multi_reduction <add>, %24, %cst_12 [1] : vector<3x8xf32> to vector<3xf32>
    %26 = vector.shape_cast %25 : vector<3xf32> to vector<3x1xf32>
    %27 = arith.addf %26, %19 : vector<3x1xf32>
    %28 = vector.extract_strided_slice %27 {offsets = [0, 0], sizes = [1, 1], strides = [1, 1]} : vector<3x1xf32> to vector<1x1xf32>
    %29 = vector.extract_strided_slice %27 {offsets = [1, 0], sizes = [1, 1], strides = [1, 1]} : vector<3x1xf32> to vector<1x1xf32>
    %30 = arith.maximumf %28, %29 : vector<1x1xf32>
    %31 = vector.extract_strided_slice %27 {offsets = [2, 0], sizes = [1, 1], strides = [1, 1]} : vector<3x1xf32> to vector<1x1xf32>
    %32 = arith.maximumf %30, %31 : vector<1x1xf32>
    %33 = vector.broadcast %32 : vector<1x1xf32> to vector<3x1xf32>
    %34 = arith.subf %27, %33 : vector<3x1xf32>
    %35 = math.exp %34 : vector<3x1xf32>
    %36 = vector.extract_strided_slice %35 {offsets = [0, 0], sizes = [1, 1], strides = [1, 1]} : vector<3x1xf32> to vector<1x1xf32>
    %37 = vector.extract_strided_slice %35 {offsets = [1, 0], sizes = [1, 1], strides = [1, 1]} : vector<3x1xf32> to vector<1x1xf32>
    %38 = arith.addf %36, %37 : vector<1x1xf32>
    %39 = vector.extract_strided_slice %35 {offsets = [2, 0], sizes = [1, 1], strides = [1, 1]} : vector<3x1xf32> to vector<1x1xf32>
    %40 = arith.addf %38, %39 : vector<1x1xf32>
    %41 = math.log %40 : vector<1x1xf32>
    %42 = vector.broadcast %41 : vector<1x1xf32> to vector<3x1xf32>
    %43 = arith.subf %34, %42 : vector<3x1xf32>
    %c0_13 = arith.constant 0 : index
    %c0_14 = arith.constant 0 : index
    %c0_15 = arith.constant 0 : index
    %44 = vector.load %arg6[%c0_13, %c0_14, %c0_15] : memref<2x3x1xf32, #tpu.memory_space<vmem>>, vector<1x3x1xf32>
    %45 = vector.shape_cast %44 : vector<1x3x1xf32> to vector<3x1xf32>
    %46 = vector.shape_cast %43 : vector<3x1xf32> to vector<1x3x1xf32>
    tpu.vector_store %arg6[%c0_13, %c0_14, %c0_15], %46 {strides = array<i32>} : memref<2x3x1xf32, #tpu.memory_space<vmem>>, vector<1x3x1xf32>,
    %47 = vector.extract_strided_slice %17 {offsets = [16, 0], sizes = [8, 13], strides = [1, 1]} : vector<28x13xf32> to vector<8x13xf32>
    %48 = vector.shape_cast %47 : vector<8x13xf32> to vector<1x8x13xf32>
    %49 = vector.broadcast %48 : vector<1x8x13xf32> to vector<3x8x13xf32>
    %50 = arith.mulf %49, %18 : vector<3x8x13xf32>
    %cst_16 = arith.constant dense<0.000000e+00> : vector<3x8xf32>
    %51 = vector.multi_reduction <add>, %50, %cst_16 [2] : vector<3x8x13xf32> to vector<3x8xf32>
    %cst_17 = arith.constant dense<0.000000e+00> : vector<3xf32>
    %52 = vector.multi_reduction <add>, %51, %cst_17 [1] : vector<3x8xf32> to vector<3xf32>
    %53 = vector.shape_cast %52 : vector<3xf32> to vector<3x1xf32>
    %54 = arith.addf %53, %19 : vector<3x1xf32>
    %55 = vector.extract_strided_slice %54 {offsets = [0, 0], sizes = [1, 1], strides = [1, 1]} : vector<3x1xf32> to vector<1x1xf32>
    %56 = vector.extract_strided_slice %54 {offsets = [1, 0], sizes = [1, 1], strides = [1, 1]} : vector<3x1xf32> to vector<1x1xf32>
    %57 = arith.maximumf %55, %56 : vector<1x1xf32>
    %58 = vector.extract_strided_slice %54 {offsets = [2, 0], sizes = [1, 1], strides = [1, 1]} : vector<3x1xf32> to vector<1x1xf32>
    %59 = arith.maximumf %57, %58 : vector<1x1xf32>
    %60 = vector.broadcast %59 : vector<1x1xf32> to vector<3x1xf32>
    %61 = arith.subf %54, %60 : vector<3x1xf32>
    %62 = math.exp %61 : vector<3x1xf32>
    %63 = vector.extract_strided_slice %62 {offsets = [0, 0], sizes = [1, 1], strides = [1, 1]} : vector<3x1xf32> to vector<1x1xf32>
    %64 = vector.extract_strided_slice %62 {offsets = [1, 0], sizes = [1, 1], strides = [1, 1]} : vector<3x1xf32> to vector<1x1xf32>
    %65 = arith.addf %63, %64 : vector<1x1xf32>
    %66 = vector.extract_strided_slice %62 {offsets = [2, 0], sizes = [1, 1], strides = [1, 1]} : vector<3x1xf32> to vector<1x1xf32>
    %67 = arith.addf %65, %66 : vector<1x1xf32>
    %68 = math.log %67 : vector<1x1xf32>
    %69 = vector.broadcast %68 : vector<1x1xf32> to vector<3x1xf32>
    %70 = arith.subf %61, %69 : vector<3x1xf32>
    %c1 = arith.constant 1 : index
    %c0_18 = arith.constant 0 : index
    %c0_19 = arith.constant 0 : index
    %71 = vector.load %arg6[%c1, %c0_18, %c0_19] : memref<2x3x1xf32, #tpu.memory_space<vmem>>, vector<1x3x1xf32>
    %72 = vector.shape_cast %71 : vector<1x3x1xf32> to vector<3x1xf32>
    %73 = vector.shape_cast %70 : vector<3x1xf32> to vector<1x3x1xf32>
    tpu.vector_store %arg6[%c1, %c0_18, %c0_19], %73 {strides = array<i32>} : memref<2x3x1xf32, #tpu.memory_space<vmem>>, vector<1x3x1xf32>,
    return
  }
  func.func @transform_0(%arg0: i32) -> (i32, i32) {
    %c0_i32 = arith.constant 0 : i32
    %c0_i32_0 = arith.constant 0 : i32
    %c0_i32_1 = arith.constant 0 : i32
    return %c0_i32, %c0_i32_0 : i32, i32
  }
  func.func @transform_1(%arg0: i32) -> (i32, i32) {
    %c0_i32 = arith.constant 0 : i32
    %c0_i32_0 = arith.constant 0 : i32
    %c0_i32_1 = arith.constant 0 : i32
    return %c0_i32, %c0_i32_0 : i32, i32
  }
  func.func @transform_2(%arg0: i32) -> (i32, i32) {
    %c0_i32 = arith.constant 0 : i32
    %c0_i32_0 = arith.constant 0 : i32
    %c0_i32_1 = arith.constant 0 : i32
    return %c0_i32, %c0_i32_0 : i32, i32
  }
  func.func @transform_3(%arg0: i32) -> (i32, i32, i32) {
    %c0_i32 = arith.constant 0 : i32
    %c0_i32_0 = arith.constant 0 : i32
    %c0_i32_1 = arith.constant 0 : i32
    %c0_i32_2 = arith.constant 0 : i32
    return %c0_i32, %c0_i32_0, %c0_i32_1 : i32, i32, i32
  }
  func.func @transform_4(%arg0: i32) -> (i32, i32) {
    %c0_i32 = arith.constant 0 : i32
    %c0_i32_0 = arith.constant 0 : i32
    %c0_i32_1 = arith.constant 0 : i32
    return %c0_i32, %c0_i32_0 : i32, i32
  }
  func.func @transform_5(%arg0: i32) -> (i32, i32, i32) {
    %c0_i32 = arith.constant 0 : i32
    %c0_i32_0 = arith.constant 0 : i32
    %c0_i32_1 = arith.constant 0 : i32
    %c0_i32_2 = arith.constant 0 : i32
    return %c0_i32, %c0_i32_0, %c0_i32_1 : i32, i32, i32
  }
}

</mosaic_0001>

<bundles_post_ra>
// kernel: bert_cnn_forward.1
= control target key start
LH: loop header
LB: loop body
LE: loop exit
PB: predicated region body
PF: predicated region fallthrough
CT: control target
= control target key end

     0   :  { %vm1360_vm0 = vcmask 1046528   ;;  %vm1384_vm1 = vcmask 1045504   ;;  %vm1454_vm2 = vcmask 105472   ;;  %vm1483_vm3 = vcmask 1042434   ;;  %s2530_s1 = inlined_call_operand.vmem [shape: bf16[1664,128], index: 1, kind: input, shape index: {}]   ;;  %s2531_s0 = inlined_call_operand.vmem [shape: bf16[32,1664], index: 0, kind: input, shape index: {}]   ;;  %s2532_s2 = inlined_call_operand.vmem [shape: f32[1,13], index: 2, kind: input, shape index: {}]   ;;  %s2533_s3 = inlined_call_operand.vmem [shape: f32[3,8,13], index: 3, kind: input, shape index: {}]   ;;  %s2534_s4 = inlined_call_operand.vmem [shape: f32[3,1], index: 4, kind: input, shape index: {}]   ;;  %s2535_s5 = inlined_call_operand.vmem [shape: f32[2,3,1], index: 5, kind: output, shape index: {}]  }
   0x1   :  { %v1921_v0 = vld [vmem:[%s2530_s1 + $0x78] sm:$0xff]   ;;  %v1925_v4 = vld [vmem:[%s2530_s1 + $0x70] sm:$0xff]   ;;  %v1929_v8 = vld [vmem:[%s2530_s1 + $0x68] sm:$0xff]   ;;  %vm1481_vm4 = vcmask 1041409   ;;  %vm1486_vm5 = vcmask 59392   ;;  %vm1519_vm6 = vcmask 2048  }
   0x2   :  { %v1922_v1 = vld [vmem:[%s2530_s1 + $0xf8] sm:$0xff]   ;;  %1721 = vmatprep.subr.bf16.mxu0 %v1921_v0  ;;  %v1926_v5 = vld [vmem:[%s2530_s1 + $0xf0] sm:$0xff]   ;;  %v1930_v9 = vld [vmem:[%s2530_s1 + $0xe8] sm:$0xff]  }
   0x3   :  { %v1923_v2 = vld [vmem:[%s2530_s1 + $0x38] sm:$0xff]   ;;  %1749 = vmatprep.subr.bf16.mxu1 %v1922_v1  ;;  %v1927_v6 = vld [vmem:[%s2530_s1 + $0x30] sm:$0xff]   ;;  %v1931_v10 = vld [vmem:[%s2530_s1 + $0x28] sm:$0xff]  }
   0x4   :  { %v1924_v3 = vld [vmem:[%s2530_s1 + $0xb8] sm:$0xff]   ;;  %1722 = vmatpush3.bf16.msra.mxu0 %v1923_v2  ;;  %v1928_v7 = vld [vmem:[%s2530_s1 + $0xb0] sm:$0xff]   ;;  %v1932_v11 = vld [vmem:[%s2530_s1 + $0xa8] sm:$0xff]  }
   0x5   :  { %1750 = vmatpush3.bf16.msra.mxu1 %v1924_v3  ;;  %1723 = vmatprep.subr.bf16.mxu0 %v1925_v4  ;;  %v1933_v12 = vld [vmem:[%s2530_s1 + $0x60] sm:$0xff]   ;;  %v1937_v16 = vld [vmem:[%s2530_s1 + $0x58] sm:$0xff]   ;;  %v1941_v20 = vld [vmem:[%s2530_s1 + $0x50] sm:$0xff]  }
   0x6   :  { %1751 = vmatprep.subr.bf16.mxu1 %v1926_v5  ;;  %v1934_v13 = vld [vmem:[%s2530_s1 + $0xe0] sm:$0xff]   ;;  %v1938_v17 = vld [vmem:[%s2530_s1 + $0xd8] sm:$0xff]   ;;  %v1942_v21 = vld [vmem:[%s2530_s1 + $0xd0] sm:$0xff]  }
   0x7   :  { %v1935_v14 = vld [vmem:[%s2530_s1 + $0x20] sm:$0xff]   ;;  %v1939_v18 = vld [vmem:[%s2530_s1 + $0x18] sm:$0xff]   ;;  %v1943_v22 = vld [vmem:[%s2530_s1 + $0x10] sm:$0xff]  }
   0x8   :  { %1724 = vmatpush3.bf16.msra.mxu0 %v1927_v6  ;;  %v1936_v15 = vld [vmem:[%s2530_s1 + $0xa0] sm:$0xff]   ;;  %v1940_v19 = vld [vmem:[%s2530_s1 + $0x98] sm:$0xff]   ;;  %v1944_v23 = vld [vmem:[%s2530_s1 + $0x90] sm:$0xff]  }
   0x9   :  { %1752 = vmatpush3.bf16.msra.mxu1 %v1928_v7  ;;  %1725 = vmatprep.subr.bf16.mxu0 %v1929_v8  ;;  %v1945_v24 = vld [vmem:[%s2530_s1 + $0x48] sm:$0xff]   ;;  %v1949_v28 = vld [vmem:[%s2530_s1 + $0x40] sm:$0xff]   ;;  %v1959_v36 = vld [vmem:[%s2530_s1 + $0x178] sm:$0xff]  }
   0xa   :  { %1753 = vmatprep.subr.bf16.mxu1 %v1930_v9  ;;  %v1946_v25 = vld [vmem:[%s2530_s1 + $0xc8] sm:$0xff]   ;;  %v1950_v29 = vld [vmem:[%s2530_s1 + $0xc0] sm:$0xff]   ;;  %v1960_v37 = vld [vmem:[%s2530_s1 + $0x138] sm:$0xff]  }
   0xb   :  { %v1947_v26 = vld [vmem:[%s2530_s1 + $0x8] sm:$0xff]   ;;  %v1951_v30 = vld [vmem:[%s2530_s1] sm:$0xff]   ;;  %v1961_v38 = vld [vmem:[%s2530_s1 + $0x1f8] sm:$0xff]  }
   0xc   :  { %1726 = vmatpush3.bf16.msra.mxu0 %v1931_v10  ;;  %v1948_v27 = vld [vmem:[%s2530_s1 + $0x88] sm:$0xff]   ;;  %v1952_v31 = vld [vmem:[%s2530_s1 + $0x80] sm:$0xff]   ;;  %v1962_v39 = vld [vmem:[%s2530_s1 + $0x1b8] sm:$0xff]  }
   0xd   :  { %1754 = vmatpush3.bf16.msra.mxu1 %v1932_v11  ;;  %1727 = vmatprep.subr.bf16.mxu0 %v1933_v12  ;;  %v1953_v32 = vld [vmem:[%s2531_s0] ss:$52 sps:$4 sm:$0xff]   ;;  %v1955_v33 = vld [vmem:[%s2531_s0 + $0x4] ss:$52 sps:$4 sm:$0xff]   ;;  %v1956_v34 = vld [vmem:[%s2531_s0 + $0x8] ss:$52 sps:$4 sm:$0xff]  }
   0xe   :  { %1755 = vmatprep.subr.bf16.mxu1 %v1934_v13  ;;  %v1958_v35 = vld [vmem:[%s2531_s0 + $0xc] ss:$52 sps:$4 sm:$0xff]   ;;  %1045 = vmatprep.mubr.bf16.mxu0 %v1955_v33  ;;  %v1963_v40 = vld [vmem:[%s2530_s1 + $0x170] sm:$0xff]   ;;  %v1975_v52 = vld [vmem:[%s2530_s1 + $0x158] sm:$0xff]  }
   0xf   :  { %1094 = vmatprep.mubr.bf16.mxu1 %v1958_v35  ;;  %v1964_v41 = vld [vmem:[%s2530_s1 + $0x130] sm:$0xff]   ;;  %v1967_v44 = vld [vmem:[%s2530_s1 + $0x168] sm:$0xff]   ;;  %v1971_v48 = vld [vmem:[%s2530_s1 + $0x160] sm:$0xff]  }
  0x10   :  { %1728 = vmatpush3.bf16.msra.mxu0 %v1935_v14  ;;  %v1965_v42 = vld [vmem:[%s2530_s1 + $0x1f0] sm:$0xff]   ;;  %v1968_v45 = vld [vmem:[%s2530_s1 + $0x128] sm:$0xff]   ;;  %v1972_v49 = vld [vmem:[%s2530_s1 + $0x120] sm:$0xff]  }
  0x11   :  { %1756 = vmatpush3.bf16.msra.mxu1 %v1936_v15  ;;  %1729 = vmatprep.subr.bf16.mxu0 %v1937_v16  ;;  %v1966_v43 = vld [vmem:[%s2530_s1 + $0x1b0] sm:$0xff]   ;;  %v1969_v46 = vld [vmem:[%s2530_s1 + $0x1e8] sm:$0xff]   ;;  %v1973_v50 = vld [vmem:[%s2530_s1 + $0x1e0] sm:$0xff]  }
  0x12   :  { %1757 = vmatprep.subr.bf16.mxu1 %v1938_v17  ;;  %v1970_v47 = vld [vmem:[%s2530_s1 + $0x1a8] sm:$0xff]   ;;  %v1974_v51 = vld [vmem:[%s2530_s1 + $0x1a0] sm:$0xff]   ;;  %v1976_v53 = vld [vmem:[%s2530_s1 + $0x118] sm:$0xff]  }
  0x13   :  { %v1977_v54 = vld [vmem:[%s2531_s0 + $0x6c] ss:$52 sps:$4 sm:$0xff]   ;;  %v1979_v55 = vld [vmem:[%s2531_s0 + $0x74] ss:$52 sps:$4 sm:$0xff]   ;;  %v1981_v56 = vld [vmem:[%s2530_s1 + $0x1d8] sm:$0xff]  }
  0x14   :  { %1730 = vmatpush3.bf16.msra.mxu0 %v1939_v18  ;;  %v1982_v57 = vld [vmem:[%s2531_s0 + $0x68] ss:$52 sps:$4 sm:$0xff]   ;;  %v1983_v58 = vld [vmem:[%s2531_s0 + $0x70] ss:$52 sps:$4 sm:$0xff]   ;;  %v2001_v11 = vld [vmem:[%s2531_s0 + $0x18] ss:$52 sps:$4 sm:$0xff]  }
  0x15   :  { %1758 = vmatpush3.bf16.msra.mxu1 %v1940_v19  ;;  %1731 = vmatprep.subr.bf16.mxu0 %v1941_v20  ;;  %v1984_v59 = vld [vmem:[%s2530_s1 + $0x198] sm:$0xff]   ;;  %v1985_v60 = vld [vmem:[%s2530_s1 + $0x150] sm:$0xff]   ;;  %v1989_v0 = vld [vmem:[%s2530_s1 + $0x148] sm:$0xff]  }
  0x16   :  { %1759 = vmatprep.subr.bf16.mxu1 %v1942_v21  ;;  %v1986_v61 = vld [vmem:[%s2530_s1 + $0x110] sm:$0xff]   ;;  %v1990_v1 = vld [vmem:[%s2530_s1 + $0x108] sm:$0xff]   ;;  %v1993_v4 = vld [vmem:[%s2530_s1 + $0x140] sm:$0xff]  }
  0x17   :  { %v1987_v62 = vld [vmem:[%s2530_s1 + $0x1d0] sm:$0xff]   ;;  %v1991_v2 = vld [vmem:[%s2530_s1 + $0x1c8] sm:$0xff]   ;;  %v1994_v5 = vld [vmem:[%s2530_s1 + $0x100] sm:$0xff]  }
  0x18   :  { %1732 = vmatpush3.bf16.msra.mxu0 %v1943_v22  ;;  %v1988_v63 = vld [vmem:[%s2530_s1 + $0x190] sm:$0xff]   ;;  %v1992_v3 = vld [vmem:[%s2530_s1 + $0x188] sm:$0xff]   ;;  %v1995_v6 = vld [vmem:[%s2530_s1 + $0x1c0] sm:$0xff]  }
  0x19   :  { %1760 = vmatpush3.bf16.msra.mxu1 %v1944_v23  ;;  %1733 = vmatprep.subr.bf16.mxu0 %v1945_v24  ;;  %v1996_v7 = vld [vmem:[%s2531_s0 + $0x10] ss:$52 sps:$4 sm:$0xff]   ;;  %v1998_v8 = vld [vmem:[%s2531_s0 + $0x14] ss:$52 sps:$4 sm:$0xff]   ;;  %v2000_v10 = vld [vmem:[%s2530_s1 + $0x278] sm:$0xff]  }
  0x1a   :  { %1761 = vmatprep.subr.bf16.mxu1 %v1946_v25  ;;  %v1999_v9 = vld [vmem:[%s2530_s1 + $0x180] sm:$0xff]   ;;  %v2003_v12 = vld [vmem:[%s2531_s0 + $0x1c] ss:$52 sps:$4 sm:$0xff]   ;;  %v2013_v21 = vld [vmem:[%s2531_s0 + $0x78] ss:$52 sps:$4 sm:$0xff]  }
  0x1b   :  { %v2004_v13 = vld [vmem:[%s2530_s1 + $0x238] sm:$0xff]   ;;  %v2007_v16 = vld [vmem:[%s2530_s1 + $0x270] sm:$0xff]   ;;  %v2014_v22 = vld [vmem:[%s2530_s1 + $0x268] sm:$0xff]  }
  0x1c   :  { %1734 = vmatpush3.bf16.msra.mxu0 %v1947_v26  ;;  %v2005_v14 = vld [vmem:[%s2530_s1 + $0x2f8] sm:$0xff]   ;;  %v2008_v17 = vld [vmem:[%s2530_s1 + $0x230] sm:$0xff]   ;;  %v2017_v24 = vld [vmem:[%s2530_s1 + $0x228] sm:$0xff]  }
  0x1d   :  { %1762 = vmatpush3.bf16.msra.mxu1 %v1948_v27  ;;  %1735 = vmatprep.subr.bf16.mxu0 %v1949_v28  ;;  %v2006_v15 = vld [vmem:[%s2530_s1 + $0x2b8] sm:$0xff]   ;;  %v2009_v18 = vld [vmem:[%s2530_s1 + $0x2f0] sm:$0xff]   ;;  %v2019_v26 = vld [vmem:[%s2530_s1 + $0x2e8] sm:$0xff]  }
  0x1e   :  { %1763 = vmatprep.subr.bf16.mxu1 %v1950_v29  ;;  %v2010_v19 = vld [vmem:[%s2531_s0 + $0x7c] ss:$52 sps:$4 sm:$0xff]   ;;  %v2015_v23 = vld [vmem:[%s2531_s0 + $0x84] ss:$52 sps:$4 sm:$0xff]   ;;  %v2018_v25 = vld [vmem:[%s2531_s0 + $0x80] ss:$52 sps:$4 sm:$0xff]  }
  0x1f   :  { %v2012_v20 = vld [vmem:[%s2530_s1 + $0x2b0] sm:$0xff]   ;;  %v2020_v27 = vld [vmem:[%s2530_s1 + $0x2a8] sm:$0xff]   ;;  %v2021_v28 = vld [vmem:[%s2530_s1 + $0x260] sm:$0xff]  }
  0x20   :  { %1736 = vmatpush3.bf16.msra.mxu0 %v1951_v30  ;;  %v2022_v29 = vld [vmem:[%s2530_s1 + $0x220] sm:$0xff]   ;;  %v2026_v33 = vld [vmem:[%s2530_s1 + $0x218] sm:$0xff]  }
  0x21   :  { %1764 = vmatpush3.bf16.msra.mxu1 %v1952_v31  ;;  %1777 = vmatprep.subr.bf16.mxu0 %v1959_v36  ;;  %v2023_v30 = vld [vmem:[%s2530_s1 + $0x2e0] sm:$0xff]   ;;  %v2028_v35 = vld [vmem:[%s2530_s1 + $0x298] sm:$0xff]   ;;  %v2029_v36 = vld [vmem:[%s2530_s1 + $0x250] sm:$0xff]  }
  0x22   :  { %1805 = vmatprep.subr.bf16.mxu1 %v1961_v38  ;;  %v2024_v31 = vld [vmem:[%s2530_s1 + $0x2a0] sm:$0xff]   ;;  %v2031_v38 = vld [vmem:[%s2530_s1 + $0x2d0] sm:$0xff]  }
  0x23   :  { %1046 = vmatmul.mubr.bf16.vlgmr.msra.gmra.mxu0 %v1953_v32  ;;  %v2025_v32 = vld [vmem:[%s2530_s1 + $0x258] sm:$0xff]  }
  0x24   :  { %1095 = vmatmul.mubr.bf16.vlgmr.msra.gmra.mxu1 %v1956_v34  ;;  %1778 = vmatpush3.bf16.msra.mxu0 %v1960_v37  ;;  %v2027_v34 = vld [vmem:[%s2530_s1 + $0x2d8] sm:$0xff]   ;;  %v2030_v37 = vld [vmem:[%s2530_s1 + $0x210] sm:$0xff]  }
  0x25   :  { %1806 = vmatpush3.bf16.msra.mxu1 %v1962_v39  ;;  %1779 = vmatprep.subr.bf16.mxu0 %v1963_v40  ;;  %v2032_v39 = vld [vmem:[%s2530_s1 + $0x290] sm:$0xff]   ;;  %v2033_v40 = vld [vmem:[%s2530_s1 + $0x248] sm:$0xff]  }
  0x26   :  { %1807 = vmatprep.subr.bf16.mxu1 %v1965_v42  ;;  %1053 = vmatprep.mubr.bf16.mxu0 %v1977_v54  ;;  %v2035_v42 = vld [vmem:[%s2530_s1 + $0x2c8] sm:$0xff]  }
  0x27   :  { %1102 = vmatprep.mubr.bf16.mxu1 %v1979_v55  ;;  %v2049_v54 = vld [vmem:[%s2531_s0 + $0x8c] ss:$52 sps:$4 sm:$0xff]   ;;  %v2051_v55 = vld [vmem:[%s2531_s0 + $0x88] ss:$52 sps:$4 sm:$0xff]  }
  0x28   :  { %1780 = vmatpush3.bf16.msra.mxu0 %v1964_v41  ;;  %v2034_v41 = vld [vmem:[%s2530_s1 + $0x208] sm:$0xff]  }
  0x29   :  { %1808 = vmatpush3.bf16.msra.mxu1 %v1966_v43  ;;  %1781 = vmatprep.subr.bf16.mxu0 %v1967_v44  ;;  %v2036_v43 = vld [vmem:[%s2530_s1 + $0x288] sm:$0xff]   ;;  %v2037_v44 = vld [vmem:[%s2530_s1 + $0x240] sm:$0xff]  }
  0x2a   :  { %1809 = vmatprep.subr.bf16.mxu1 %v1969_v46  ;;  %v2039_v46 = vld [vmem:[%s2530_s1 + $0x2c0] sm:$0xff]  }
  0x2b   :  { %1054 = vmatmul.mubr.bf16.gmra.mxu0 %v1982_v57  ;;  %v2053_v57 = vld [vmem:[%s2531_s0 + $0x94] ss:$52 sps:$4 sm:$0xff]  }
  0x2c   :  { %1782 = vmatpush3.bf16.msra.mxu0 %v1968_v45  ;;  %1103 = vmatmul.mubr.bf16.gmra.mxu1 %v1983_v58  ;;  %v2038_v45 = vld [vmem:[%s2530_s1 + $0x200] sm:$0xff]  }
  0x2d   :  { %1810 = vmatpush3.bf16.msra.mxu1 %v1970_v47  ;;  %1783 = vmatprep.subr.bf16.mxu0 %v1971_v48  ;;  %v2040_v47 = vld [vmem:[%s2531_s0 + $0x20] ss:$52 sps:$4 sm:$0xff]   ;;  %v2042_v48 = vld [vmem:[%s2531_s0 + $0x24] ss:$52 sps:$4 sm:$0xff]  }
  0x2e   :  { %1811 = vmatprep.subr.bf16.mxu1 %v1973_v50  ;;  %1143 = vmatprep.mubr.bf16.mxu0 %v1998_v8  ;;  %v2044_v50 = vld [vmem:[%s2530_s1 + $0x338] sm:$0xff]   ;;  %v2056_v58 = vld [vmem:[%s2530_s1 + $0x320] sm:$0xff]  }
  0x2f   :  { %1192 = vmatprep.mubr.bf16.mxu1 %v2003_v12 }
  0x30   :  { %1784 = vmatpush3.bf16.msra.mxu0 %v1972_v49  ;;  %v2043_v49 = vld [vmem:[%s2530_s1 + $0x280] sm:$0xff]  }
  0x31   :  { %1812 = vmatpush3.bf16.msra.mxu1 %v1974_v51  ;;  %1785 = vmatprep.subr.bf16.mxu0 %v1975_v52  ;;  %v2045_v51 = vld [vmem:[%s2531_s0 + $0x28] ss:$52 sps:$4 sm:$0xff]   ;;  %v2047_v52 = vld [vmem:[%s2531_s0 + $0x2c] ss:$52 sps:$4 sm:$0xff]  }
  0x32   :  { %1813 = vmatprep.subr.bf16.mxu1 %v1981_v56  ;;  %v2052_v56 = vld [vmem:[%s2530_s1 + $0x328] sm:$0xff]  }
  0x34   :  { %1786 = vmatpush3.bf16.msra.mxu0 %v1976_v53  ;;  %v2048_v53 = vld [vmem:[%s2530_s1 + $0x330] sm:$0xff]  }
  0x35   :  { %1814 = vmatpush3.bf16.msra.mxu1 %v1984_v59  ;;  %1787 = vmatprep.subr.bf16.mxu0 %v1985_v60  ;;  %v2055_v59 = vld [vmem:[%s2531_s0 + $0x90] ss:$52 sps:$4 sm:$0xff]   ;;  %v2057_v60 = vld [vmem:[%s2530_s1 + $0x318] sm:$0xff]  }
  0x36   :  { %1815 = vmatprep.subr.bf16.mxu1 %v1987_v62  ;;  %v2058_v62 = vld [vmem:[%s2530_s1 + $0x310] sm:$0xff]  }
  0x38   :  { %1788 = vmatpush3.bf16.msra.mxu0 %v1986_v61  ;;  %v2061_v61 = vld [vmem:[%s2531_s0 + $0x30] ss:$52 sps:$4 sm:$0xff]  }
  0x39   :  { %1816 = vmatpush3.bf16.msra.mxu1 %v1988_v63  ;;  %1789 = vmatprep.subr.bf16.mxu0 %v1989_v0  ;;  %v2059_v63 = vld [vmem:[%s2530_s1 + $0x308] sm:$0xff]   ;;  %v2060_v0 = vld [vmem:[%s2530_s1 + $0x300] sm:$0xff]   ;;  %s2072_s1 = smov 102  }
  0x3a   :  { %1817 = vmatprep.subr.bf16.mxu1 %v1991_v2 }
  0x3c   :  { %1790 = vmatpush3.bf16.msra.mxu0 %v1990_v1  ;;  %v2062_v1 = vld [vmem:[%s2531_s0 + $0x98] ss:$52 sps:$4 sm:$0xff]   ;;  %s2071_s0 = smov 115  }
  0x3d   :  { %1818 = vmatpush3.bf16.msra.mxu1 %v1992_v3  ;;  %1791 = vmatprep.subr.bf16.mxu0 %v1993_v4 }
  0x3e   :  { %1819 = vmatprep.subr.bf16.mxu1 %v1995_v6 }
  0x40   :  { %1792 = vmatpush3.bf16.msra.mxu0 %v1994_v5 }
  0x41   :  { %1820 = vmatpush3.bf16.msra.mxu1 %v1999_v9  ;;  %1833 = vmatprep.subr.bf16.mxu0 %v2000_v10 }
  0x42   :  { %1861 = vmatprep.subr.bf16.mxu1 %v2005_v14 }
  0x43   :  { %1144 = vmatmul.mubr.bf16.vlgmr.msra.gmra.mxu0 %v1996_v7 }
  0x44   :  { %1834 = vmatpush3.bf16.msra.mxu0 %v2004_v13  ;;  %1193 = vmatmul.mubr.bf16.vlgmr.msra.gmra.mxu1 %v2001_v11 }
  0x45   :  { %1862 = vmatpush3.bf16.msra.mxu1 %v2006_v15  ;;  %1835 = vmatprep.subr.bf16.mxu0 %v2007_v16 }
  0x46   :  { %1863 = vmatprep.subr.bf16.mxu1 %v2009_v18  ;;  %1151 = vmatprep.mubr.bf16.mxu0 %v2010_v19 }
  0x47   :  { %1200 = vmatprep.mubr.bf16.mxu1 %v2015_v23 }
  0x48   :  { %1836 = vmatpush3.bf16.msra.mxu0 %v2008_v17 }
  0x49   :  { %1864 = vmatpush3.bf16.msra.mxu1 %v2012_v20  ;;  %1837 = vmatprep.subr.bf16.mxu0 %v2014_v22 }
  0x4a   :  { %1865 = vmatprep.subr.bf16.mxu1 %v2019_v26 }
  0x4b   :  { %1152 = vmatmul.mubr.bf16.gmra.mxu0 %v2013_v21 }
  0x4c   :  { %1838 = vmatpush3.bf16.msra.mxu0 %v2017_v24  ;;  %1201 = vmatmul.mubr.bf16.gmra.mxu1 %v2018_v25 }
  0x4d   :  { %1866 = vmatpush3.bf16.msra.mxu1 %v2020_v27  ;;  %1839 = vmatprep.subr.bf16.mxu0 %v2021_v28 }
  0x4e   :  { %1867 = vmatprep.subr.bf16.mxu1 %v2023_v30  ;;  %1241 = vmatprep.mubr.bf16.mxu0 %v2042_v48 }
  0x4f   :  { %1290 = vmatprep.mubr.bf16.mxu1 %v2047_v52 }
  0x50   :  { %1840 = vmatpush3.bf16.msra.mxu0 %v2022_v29 }
  0x51   :  { %1868 = vmatpush3.bf16.msra.mxu1 %v2024_v31  ;;  %1841 = vmatprep.subr.bf16.mxu0 %v2025_v32 }
  0x52   :  { %1869 = vmatprep.subr.bf16.mxu1 %v2027_v34 }
  0x54   :  { %1842 = vmatpush3.bf16.msra.mxu0 %v2026_v33 }
  0x55   :  { %1870 = vmatpush3.bf16.msra.mxu1 %v2028_v35  ;;  %1843 = vmatprep.subr.bf16.mxu0 %v2029_v36 }
  0x56   :  { %1871 = vmatprep.subr.bf16.mxu1 %v2031_v38 }
  0x58   :  { %1844 = vmatpush3.bf16.msra.mxu0 %v2030_v37 }
  0x59   :  { %1872 = vmatpush3.bf16.msra.mxu1 %v2032_v39  ;;  %1845 = vmatprep.subr.bf16.mxu0 %v2033_v40 }
  0x5a   :  { %1873 = vmatprep.subr.bf16.mxu1 %v2035_v42 }
  0x5c   :  { %1846 = vmatpush3.bf16.msra.mxu0 %v2034_v41 }
  0x5d   :  { %1874 = vmatpush3.bf16.msra.mxu1 %v2036_v43  ;;  %1847 = vmatprep.subr.bf16.mxu0 %v2037_v44 }
  0x5e   :  { %1875 = vmatprep.subr.bf16.mxu1 %v2039_v46 }
  0x60   :  { %1848 = vmatpush3.bf16.msra.mxu0 %v2038_v45 }
  0x61   :  { %1876 = vmatpush3.bf16.msra.mxu1 %v2043_v49  ;;  %1899 = vmatprep.subr.bf16.mxu0 %v2044_v50 }
  0x63   :  { %1242 = vmatmul.mubr.bf16.vlgmr.msra.gmra.mxu0 %v2040_v47 }
  0x64   :  { %1900 = vmatpush3.bf16.msra.mxu0 %v2044_v50  ;;  %1291 = vmatmul.mubr.bf16.vlgmr.msra.gmra.mxu1 %v2045_v51 }
  0x65   :  { %1901 = vmatprep.subr.bf16.mxu0 %v2048_v53  ;;  %1249 = vmatprep.mubr.bf16.mxu0 %v2049_v54 }
  0x66   :  { %1298 = vmatprep.mubr.bf16.mxu1 %v2053_v57 }
  0x68   :  { %1902 = vmatpush3.bf16.msra.mxu0 %v2048_v53 }
  0x69   :  { %1903 = vmatprep.subr.bf16.mxu0 %v2052_v56 }
  0x6b   :  { %1250 = vmatmul.mubr.bf16.gmra.mxu0 %v2051_v55 }
  0x6c   :  { %1904 = vmatpush3.bf16.msra.mxu0 %v2052_v56  ;;  %1299 = vmatmul.mubr.bf16.gmra.mxu1 %v2055_v59 }
  0x6d   :  { %1905 = vmatprep.subr.bf16.mxu0 %v2056_v58  ;;  %1915 = vmatprep.mubr.bf16.mxu0 %v2061_v61 }
  0x70   :  { %1906 = vmatpush3.bf16.msra.mxu0 %v2056_v58 }
  0x71   :  { %1907 = vmatprep.subr.bf16.mxu0 %v2057_v60 }
  0x74   :  { %1908 = vmatpush3.bf16.msra.mxu0 %v2057_v60 }
  0x75   :  { %1909 = vmatprep.subr.bf16.mxu0 %v2058_v62 }
  0x78   :  { %1910 = vmatpush3.bf16.msra.mxu0 %v2058_v62 }
  0x79   :  { %1911 = vmatprep.subr.bf16.mxu0 %v2059_v63 }
  0x7c   :  { %1912 = vmatpush3.bf16.msra.mxu0 %v2059_v63 }
  0x7d   :  { %1913 = vmatprep.subr.bf16.mxu0 %v2060_v0 }
  0x80   :  { %1914 = vmatpush3.bf16.msra.mxu0 %v2060_v0 }
  0x83   :  { %1916 = vmatmul.mubr.bf16.vlgmr.msra.gmra.mxu0 %v2062_v1 }
  0xe3   :  { %v1737_v2 = vpop.f32.mrf.mxu0 }
  0xe4   :  { %v1765_v3 = vpop.f32.mrf.mxu1 }
  0xe5   :  { %v1738_v4 = vpop.f32.mrf.mxu0 }
  0xe6   :  { %v1766_v5 = vpop.f32.mrf.mxu1  ;;  %v1739_v45 = vadd.f32 %v1738_v4, %v1737_v2 }
  0xe7   :  { %v1740_v6 = vpop.f32.mrf.mxu0  ;;  %v1767_v46 = vadd.f32 %v1766_v5, %v1765_v3 }
  0xe8   :  { %v1768_v7 = vpop.f32.mrf.mxu1 }
  0xe9   :  { %v1741_v8 = vpop.f32.mrf.mxu0  ;;  %v1097_v59 = vadd.f32 %v1767_v46, %v1739_v45 }
  0xea   :  { %v1769_v10 = vpop.f32.mrf.mxu1  ;;  %v1742_v49 = vadd.f32 %v1741_v8, %v1740_v6 }
  0xeb   :  { %v1743_v9 = vpop.f32.mrf.mxu0  ;;  %v1770_v50 = vadd.f32 %v1769_v10, %v1768_v7 }
  0xec   :  { %v1771_v11 = vpop.f32.mrf.mxu1 }
  0xed   :  { %v1744_v12 = vpop.f32.mrf.mxu0  ;;  %v1100_v61 = vadd.f32 %v1770_v50, %v1742_v49 }
  0xee   :  { %v1772_v13 = vpop.f32.mrf.mxu1  ;;  %v1745_v51 = vadd.f32 %v1744_v12, %v1743_v9 }
  0xef   :  { %v1746_v14 = vpop.f32.mrf.mxu0  ;;  %v1773_v52 = vadd.f32 %v1772_v13, %v1771_v11 }
  0xf0   :  { %v1774_v15 = vpop.f32.mrf.mxu1 }
  0xf1   :  { %v1747_v16 = vpop.f32.mrf.mxu0  ;;  %v1105_v62 = vadd.f32 %v1773_v52, %v1745_v51 }
  0xf2   :  { %v1775_v18 = vpop.f32.mrf.mxu1  ;;  %v1748_v47 = vadd.f32 %v1747_v16, %v1746_v14 }
  0xf3   :  { %v1776_v48 = vadd.f32 %v1775_v18, %v1774_v15 }
  0xf5   :  { %v1108_v60 = vadd.f32 %v1776_v48, %v1748_v47 }
 0x103   :  { %v1793_v17 = vpop.f32.mrf.mxu0 }
 0x104   :  { %v1821_v20 = vpop.f32.mrf.mxu1 }
 0x105   :  { %v1794_v19 = vpop.f32.mrf.mxu0 }
 0x106   :  { %v1822_v22 = vpop.f32.mrf.mxu1  ;;  %v1795_v55 = vadd.f32 %v1794_v19, %v1793_v17 }
 0x107   :  { %v1796_v21 = vpop.f32.mrf.mxu0  ;;  %v1823_v2 = vadd.f32 %v1822_v22, %v1821_v20 }
 0x108   :  { %v1824_v24 = vpop.f32.mrf.mxu1  ;;  %v1146_v1 = vadd.f32 %v1795_v55, %v1097_v59 }
 0x109   :  { %v1797_v23 = vpop.f32.mrf.mxu0 }
 0x10a   :  { %v1825_v26 = vpop.f32.mrf.mxu1  ;;  %v1798_v57 = vadd.f32 %v1797_v23, %v1796_v21  ;;  %v1195_v13 = vadd.f32 %v1823_v2, %v1146_v1 }
 0x10b   :  { %v1799_v25 = vpop.f32.mrf.mxu0  ;;  %v1826_v6 = vadd.f32 %v1825_v26, %v1824_v24 }
 0x10c   :  { %v1827_v28 = vpop.f32.mrf.mxu1  ;;  %v1149_v5 = vadd.f32 %v1798_v57, %v1100_v61 }
 0x10d   :  { %v1800_v27 = vpop.f32.mrf.mxu0 }
 0x10e   :  { %v1828_v30 = vpop.f32.mrf.mxu1  ;;  %v1801_v58 = vadd.f32 %v1800_v27, %v1799_v25  ;;  %v1198_v16 = vadd.f32 %v1826_v6, %v1149_v5 }
 0x10f   :  { %v1802_v29 = vpop.f32.mrf.mxu0  ;;  %v1829_v8 = vadd.f32 %v1828_v30, %v1827_v28 }
 0x110   :  { %v1830_v32 = vpop.f32.mrf.mxu1  ;;  %v1154_v7 = vadd.f32 %v1801_v58, %v1105_v62  ;;  %v1719_v58 = vld [vmem:[%s2532_s2] ss:$0 sm:$0xff] }
 0x111   :  { %v1803_v31 = vpop.f32.mrf.mxu0 }
 0x112   :  { %v1831_v34 = vpop.f32.mrf.mxu1  ;;  %v1804_v56 = vadd.f32 %v1803_v31, %v1802_v29  ;;  %v1203_v17 = vadd.f32 %v1829_v8, %v1154_v7 }
 0x113   :  { %v1832_v4 = vadd.f32 %v1831_v34, %v1830_v32 }
 0x114   :  { %v1157_v3 = vadd.f32 %v1804_v56, %v1108_v60 }
 0x116   :  { %v1206_v14 = vadd.f32 %v1832_v4, %v1157_v3 }
 0x123   :  { %v1849_v33 = vpop.f32.mrf.mxu0 }
 0x124   :  { %v1877_v36 = vpop.f32.mrf.mxu1 }
 0x125   :  { %v1850_v35 = vpop.f32.mrf.mxu0 }
 0x126   :  { %v1878_v38 = vpop.f32.mrf.mxu1  ;;  %v1851_v9 = vadd.f32 %v1850_v35, %v1849_v33 }
 0x127   :  { %v1852_v37 = vpop.f32.mrf.mxu0  ;;  %v1879_v19 = vadd.f32 %v1878_v38, %v1877_v36 }
 0x128   :  { %v1880_v40 = vpop.f32.mrf.mxu1  ;;  %v1244_v18 = vadd.f32 %v1851_v9, %v1195_v13 }
 0x129   :  { %v1853_v39 = vpop.f32.mrf.mxu0 }
 0x12a   :  { %v1881_v42 = vpop.f32.mrf.mxu1  ;;  %v1854_v15 = vadd.f32 %v1853_v39, %v1852_v37  ;;  %v1293_v28 = vadd.f32 %v1879_v19, %v1244_v18 }
 0x12b   :  { %v1855_v41 = vpop.f32.mrf.mxu0  ;;  %v1882_v24 = vadd.f32 %v1881_v42, %v1880_v40 }
 0x12c   :  { %v1883_v44 = vpop.f32.mrf.mxu1  ;;  %v1247_v27 = vadd.f32 %v1854_v15, %v1198_v16 }
 0x12d   :  { %v1856_v43 = vpop.f32.mrf.mxu0 }
 0x12e   :  { %v1884_v54 = vpop.f32.mrf.mxu1  ;;  %v1857_v11 = vadd.f32 %v1856_v43, %v1855_v41  ;;  %v1296_v34 = vadd.f32 %v1882_v24, %v1247_v27 }
 0x12f   :  { %v1858_v53 = vpop.f32.mrf.mxu0  ;;  %v1885_v22 = vadd.f32 %v1884_v54, %v1883_v44 }
 0x130   :  { %v1886_v0 = vpop.f32.mrf.mxu1  ;;  %v1252_v20 = vadd.f32 %v1857_v11, %v1203_v17 }
 0x131   :  { %v1859_v63 = vpop.f32.mrf.mxu0 }
 0x132   :  { %v1860_v10 = vadd.f32 %v1859_v63, %v1858_v53  ;;  %v1887_v12 = vpop.f32.mrf.mxu1  ;;  %v1301_v30 = vadd.f32 %v1885_v22, %v1252_v20  ;;  %v1448_v22 = vld [vmem:[%s2533_s3 + $0x8] sm:$0xff] }
 0x133   :  { %v1888_v23 = vadd.f32 %v1887_v12, %v1886_v0 }
 0x134   :  { %v1255_v21 = vadd.f32 %v1860_v10, %v1206_v14 }
 0x136   :  { %v1304_v29 = vadd.f32 %v1888_v23, %v1255_v21 }
 0x143   :  { %v1917_v25 = vpop.f32.mrf.mxu0 }
 0x144   :  { %v1350_v35 = vadd.f32 %v1917_v25, %v1301_v30 }
 0x145   :  { %v1341_v26 = vpop.f32.mrf.mxu0 }
 0x146   :  { %v1342_v32 = vadd.f32 %v1341_v26, %v1293_v28  ;;  %v1364_v43 = vrot.slane %v1350_v35, 1  ;;  %v1388_v45 = vrot.slane %v1350_v35, 2  ;;  %v1449_v26 = vld [vmem:[%s2533_s3 + $0x10] sm:$0xff] }
 0x147   :  { %v1918_v31 = vpop.f32.mrf.mxu0 }
 0x148   :  { %v1353_v33 = vadd.f32 %v1918_v31, %v1304_v29  ;;  %v1361_v36 = vrot.slane %v1342_v32, 1  ;;  %v1385_v48 = vrot.slane %v1342_v32, 2 }
 0x149   :  { %v1344_v37 = vpop.f32.mrf.mxu0 }
 0x14a   :  { %v1345_v39 = vadd.f32 %v1344_v37, %v1296_v34  ;;  %v1366_v41 = vrot.slane %v1353_v33, 1  ;;  %v1390_v50 = vrot.slane %v1353_v33, 2  ;;  %v1447_v34 = vld [vmem:[%s2533_s3] sm:$0xff] }
 0x14c   :  { %1374 = vrot.lane.b32.xlu1 %v1366_v41, %s2071_s0  ;;  %v1362_v38 = vrot.slane %v1345_v39, 1  ;;  %v1386_v42 = vrot.slane %v1345_v39, 2  ;;  %v1367_v44 = vsel %vm1360_vm0, %v1364_v43, %v1366_v41  ;;  %v1391_v51 = vsel %vm1384_vm1, %v1388_v45, %v1390_v50 }
 0x14e   :  { %v1363_v40 = vsel %vm1360_vm0, %v1361_v36, %v1362_v38  ;;  %v1365_v46 = vsel %vm1360_vm0, %v1362_v38, %v1364_v43  ;;  %v1389_v47 = vsel %vm1384_vm1, %v1386_v42, %v1388_v45  ;;  %v1387_v49 = vsel %vm1384_vm1, %v1385_v48, %v1386_v42 }
 0x14f   :  { %1368 = vrot.lane.b32.xlu0 %v1363_v40, %s2071_s0 }
 0x150   :  { %1372 = vrot.lane.b32.xlu1 %v1367_v44, %s2071_s0  ;;  %v1467_v44 = vlaneseq }
 0x153   :  { %1370 = vrot.lane.b32.xlu0 %v1365_v46, %s2071_s0  ;;  %v1468_v46 = vand.u32 127, %v1467_v44 }
 0x154   :  { %1394 = vrot.lane.b32.xlu1 %v1389_v47, %s2072_s1  ;;  %v1470_v47 = vshrl.u32 %v1467_v44, 7 }
 0x157   :  { %1392 = vrot.lane.b32.xlu0 %v1387_v49, %s2072_s1 }
 0x158   :  { %1398 = vrot.lane.b32.xlu1 %v1390_v50, %s2072_s1  ;;  %v1471_v50 = vsub.s32 %v1468_v46, %v1470_v47 }
 0x15b   :  { %1396 = vrot.lane.b32.xlu0 %v1391_v51, %s2072_s1 }
 0x1be   :  { %v1375_v52 = vpop.permute.xlu1 %1374 }
 0x1bf   :  { %v1383_v61 = vadd.f32 %v1375_v52, %v1353_v33 }
 0x1c1   :  { %v1369_v53 = vpop.permute.xlu0 %1368 }
 0x1c2   :  { %v1373_v54 = vpop.permute.xlu1 %1372  ;;  %v1380_v59 = vadd.f32 %v1369_v53, %v1342_v32 }
 0x1c3   :  { %v1382_v3 = vadd.f32 %v1373_v54, %v1350_v35 }
 0x1c5   :  { %v1371_v55 = vpop.permute.xlu0 %1370 }
 0x1c6   :  { %v1381_v56 = vadd.f32 %v1371_v55, %v1345_v39  ;;  %v1395_v57 = vpop.permute.xlu1 %1394 }
 0x1c8   :  { %v1405_v60 = vadd.f32 %v1395_v57, %v1381_v56 }
 0x1c9   :  { %v1393_v62 = vpop.permute.xlu0 %1392 }
 0x1ca   :  { %v1416_v63 = vadd.f32 %v1719_v58, %v1405_v60  ;;  %v1404_v0 = vadd.f32 %v1393_v62, %v1380_v59  ;;  %v1399_v1 = vpop.permute.xlu1 %1398 }
 0x1cb   :  { %v1407_v2 = vadd.f32 %v1399_v1, %v1383_v61 }
 0x1cc   :  { %v1420_v4 = vmax.f32 %v1416_v63, 0.0  ;;  %v1415_v5 = vadd.f32 %v1719_v58, %v1404_v0 }
 0x1cd   :  { %v1418_v6 = vadd.f32 %v1719_v58, %v1407_v2  ;;  %v1397_v7 = vpop.permute.xlu0 %1396  ;;  %v1450_v2 = vld [vmem:[%s2534_s4] sm:$0x7] }
 0x1ce   :  { %v1419_v8 = vmax.f32 %v1415_v5, 0.0  ;;  %v1406_v9 = vadd.f32 %v1397_v7, %v1382_v3  ;;  %v1428_v10 = vrot.slane %v1420_v4, 1  ;;  %v1438_v15 = vrot.slane %v1420_v4, 2 }
 0x1cf   :  { %v1422_v13 = vmax.f32 %v1418_v6, 0.0 }
 0x1d0   :  { %v1427_v11 = vrot.slane %v1419_v8, 1  ;;  %v1437_v12 = vrot.slane %v1419_v8, 2  ;;  %v1417_v14 = vadd.f32 %v1719_v58, %v1406_v9 }
 0x1d1   :  { %v1431_v19 = vrot.slane %v1422_v13, 1  ;;  %v1441_v27 = vrot.slane %v1422_v13, 2 }
 0x1d2   :  { %v1429_v16 = vsel %vm1360_vm0, %v1427_v11, %v1428_v10  ;;  %v1421_v17 = vmax.f32 %v1417_v14, 0.0  ;;  %v1439_v20 = vsel %vm1384_vm1, %v1437_v12, %v1438_v15 }
 0x1d3   :  { %v1435_v18 = vmax.f32 %v1419_v8, %v1429_v16  ;;  %v1500_v8 = vsub.s32 0, %v1470_v47 }
 0x1d4   :  { %v1430_v21 = vrot.slane %v1421_v17, 1  ;;  %v1440_v23 = vrot.slane %v1421_v17, 2 }
 0x1d5   :  { %v1445_v25 = vmax.f32 %v1435_v18, %v1439_v20 }
 0x1d6   :  { %v1432_v24 = vsel %vm1360_vm0, %v1430_v21, %v1431_v19  ;;  %v1442_v30 = vsel %vm1384_vm1, %v1440_v23, %v1441_v27 }
 0x1d7   :  { %v1436_v28 = vmax.f32 %v1421_v17, %v1432_v24  ;;  %v1452_v29 = vmul.f32 %v1448_v22, %v1445_v25  ;;  %v1453_v32 = vmul.f32 %v1449_v26, %v1445_v25  ;;  %v1451_v38 = vmul.f32 %v1447_v34, %v1445_v25 }
 0x1d9   :  { %v1458_v31 = vsel %vm1454_vm2, %v1452_v29, 0.0  ;;  %v1446_v33 = vmax.f32 %v1436_v28, %v1442_v30  ;;  %v1461_v37 = vsel %vm1454_vm2, %v1453_v32, 0.0  ;;  %v1455_v43 = vsel %vm1454_vm2, %v1451_v38, 0.0 }
 0x1da   :  { %1459 = vadd.xlane.f32.xlu1 %v1458_v31 }
 0x1db   :  { %v1521_v35 = vmul.f32 %v1447_v34, %v1446_v33  ;;  %v1522_v41 = vmul.f32 %v1448_v22, %v1446_v33  ;;  %v1523_v40 = vmul.f32 %v1449_v26, %v1446_v33 }
 0x1dd   :  { %v1524_v39 = vsel %vm1454_vm2, %v1521_v35, 0.0  ;;  %v1527_v36 = vsel %vm1454_vm2, %v1522_v41, 0.0  ;;  %v1530_v42 = vsel %vm1454_vm2, %v1523_v40, 0.0 }
 0x1de   :  { %1462 = vadd.xlane.f32.xlu1 %v1461_v37  ;;  %1525 = vadd.xlane.f32.xlu0 %v1524_v39 }
 0x1e2   :  { %1528 = vadd.xlane.f32.xlu0 %v1527_v36 }
 0x1e6   :  { %1456 = vadd.xlane.f32.xlu0 %v1455_v43 }
 0x1ea   :  { %1531 = vadd.xlane.f32.xlu0 %v1530_v42 }
 0x263   :  { %v1460_v48 = vpop.xlane.xlu1 %1459 }
 0x264   :  { %v1476_v53 = vrot.slane %v1460_v48, %v1471_v50 }
 0x267   :  { %v1526_v45 = vpop.xlane.xlu0 %1525  ;;  %v1463_v51 = vpop.xlane.xlu1 %1462 }
 0x268   :  { %v1480_v55 = vrot.slane %v1463_v51, %v1471_v50  ;;  %v1539_v58 = vrot.slane %v1526_v45, %v1471_v50 }
 0x26b   :  { %v1529_v49 = vpop.xlane.xlu0 %1528 }
 0x26c   :  { %v1543_v56 = vrot.slane %v1529_v49, %v1471_v50 }
 0x26e   :  { %v1548_v63 = vsel %vm1481_vm4, %v1543_v56, %v1539_v58 }
 0x26f   :  { %v1457_v52 = vpop.xlane.xlu0 %1456 }
 0x270   :  { %v1472_v54 = vrot.slane %v1457_v52, %v1471_v50 }
 0x272   :  { %v1482_v57 = vsel %vm1481_vm4, %v1476_v53, %v1472_v54 }
 0x273   :  { %v1532_v59 = vpop.xlane.xlu0 %1531  ;;  %v1484_v60 = vsel %vm1483_vm3, %v1480_v55, %v1482_v57 }
 0x274   :  { %v1547_v61 = vrot.slane %v1532_v59, %v1471_v50  ;;  %v1487_v62 = vsel %vm1486_vm5, %v1484_v60, 0.0 }
 0x275   :  { %1488 = vadd.xlane.f32.xlu1 %v1487_v62 }
 0x276   :  { %v1549_v0 = vsel %vm1483_vm3, %v1547_v61, %v1548_v63 }
 0x277   :  { %v1551_v1 = vsel %vm1486_vm5, %v1549_v0, 0.0 }
 0x278   :  { %1552 = vadd.xlane.f32.xlu0 %v1551_v1 }
 0x2fe   :  { %v1489_v3 = vpop.xlane.xlu1 %1488 }
 0x2ff   :  { %v1490_v4 = vadd.f32 %v1489_v3, %v1450_v2 }
 0x301   :  { %v1492_v5 = vrot.slane %v1490_v4, 1  ;;  %v1553_v6 = vpop.xlane.xlu0 %1552  ;;  %v1495_v10 = vrot.slane %v1490_v4, 2 }
 0x302   :  { %v1554_v7 = vadd.f32 %v1553_v6, %v1450_v2 }
 0x303   :  { %v1494_v9 = vmax.f32 %v1490_v4, %v1492_v5 }
 0x304   :  { %v1556_v11 = vrot.slane %v1554_v7, 1  ;;  %v1559_v14 = vrot.slane %v1554_v7, 2 }
 0x305   :  { %v1497_v12 = vmax.f32 %v1494_v9, %v1495_v10 }
 0x306   :  { %v1558_v13 = vmax.f32 %v1554_v7, %v1556_v11 }
 0x307   :  { %v1501_v15 = vrot.slane %v1497_v12, %v1500_v8 }
 0x308   :  { %v1561_v16 = vmax.f32 %v1558_v13, %v1559_v14 }
 0x309   :  { %v1502_v17 = vsub.f32 %v1490_v4, %v1501_v15 }
 0x30a   :  { %v1565_v18 = vrot.slane %v1561_v16, %v1500_v8 }
 0x30b   :  { %v1503_v19 = vmul.f32 1.442695, %v1502_v17 }
 0x30c   :  { %v1566_v21 = vsub.f32 %v1554_v7, %v1565_v18 }
 0x30d   :  { %2063 = vpow2.f32 %v1503_v19 }
 0x30e   :  { %v1567_v23 = vmul.f32 1.442695, %v1566_v21 }
 0x310   :  { %2065 = vpow2.f32 %v1567_v23 }
 0x31a   :  { %v2064_v20 = vpop.eup %2063 }
 0x31b   :  { %v1506_v22 = vrot.slane %v2064_v20, 1  ;;  %v1509_v24 = vrot.slane %v2064_v20, 2 }
 0x31d   :  { %v2066_v25 = vpop.eup %2065  ;;  %v1508_v27 = vadd.f32 %v2064_v20, %v1506_v22 }
 0x31e   :  { %v1570_v26 = vrot.slane %v2066_v25, 1  ;;  %v1573_v30 = vrot.slane %v2066_v25, 2 }
 0x31f   :  { %v1511_v28 = vadd.f32 %v1509_v24, %v1508_v27 }
 0x320   :  { %v1572_v29 = vadd.f32 %v2066_v25, %v1570_v26 }
 0x321   :  { %2067 = vlog2.f32 %v1511_v28 }
 0x322   :  { %v1575_v31 = vadd.f32 %v1573_v30, %v1572_v29 }
 0x324   :  { %2069 = vlog2.f32 %v1575_v31 }
 0x32e   :  { %v2068_v32 = vpop.eup %2067 }
 0x32f   :  { %v1513_v33 = vmul.f32 0.6931472, %v2068_v32 }
 0x331   :  { %v2070_v34 = vpop.eup %2069  ;;  %v1517_v35 = vrot.slane %v1513_v33, %v1500_v8 }
 0x332   :  { %v1577_v37 = vmul.f32 0.6931472, %v2070_v34 }
 0x333   :  { %v1518_v39 = vsub.f32 %v1502_v17, %v1517_v35 }
 0x334   :  { %v1581_v41 = vrot.slane %v1577_v37, %v1500_v8 }
 0x335   :  { %1520 = vst.msk [vmem:[%s2535_s5] sm:$0x7] %vm1519_vm6, %v1518_v39 }
 0x336   :  { %v1582_v36 = vsub.f32 %v1566_v21, %v1581_v41 }
 0x338   :  { %1720 = vst.msk [vmem:[%s2535_s5 + $0x4] sm:$0x7] %vm1519_vm6, %v1582_v36 }

</bundles_post_ra>
